<compile_context>
chip_gen: v5e
topology: v5e:2x2
jax: 0.10.0
libtpu: 0.0.40
codegen_flags: <defaults>
</compile_context>

<pallas_src>
import jax
import jax.numpy as jnp
from jax.experimental import pallas as pl
from jax.experimental.pallas import tpu as pltpu


# ---------------------------------------------------------------------------
# Kernels
# ---------------------------------------------------------------------------
def _pointnet_kernel(x_ref, a_ref, bias_ref, o_ref):
    # grid = (b, j, i); full f_in contraction in one step.
    # x_ref: (TM, F_in), a_ref: (F_in, TN), bias_ref: (1, TN) f32, o_ref: (TM, TN)
    acc = jnp.dot(x_ref[...], a_ref[...], preferred_element_type=jnp.float32)
    o_ref[...] = (acc + bias_ref[...]).astype(o_ref.dtype)


def _pointnet_kernel_ktiled(x_ref, a_ref, bias_ref, o_ref, acc_ref):
    # grid = (b, j, i, k); f_in is tiled, accumulate in an f32 VMEM scratch.
    k = pl.program_id(3)

    @pl.when(k == 0)
    def _():
        acc_ref[...] = jnp.zeros_like(acc_ref)

    acc_ref[...] += jnp.dot(x_ref[...], a_ref[...],
                            preferred_element_type=jnp.float32)

    @pl.when(k == pl.num_programs(3) - 1)
    def _():
        o_ref[...] = (acc_ref[...] + bias_ref[...]).astype(o_ref.dtype)


# ---------------------------------------------------------------------------
# Tile planning
# ---------------------------------------------------------------------------
def _vmem_capacity_bytes():
    try:
        info = pltpu.get_tpu_info()
        cap = getattr(info, "vmem_capacity_bytes", None)
        if cap:
            return int(cap)
    except Exception:
        pass
    return 64 << 20  # conservative default (v7x per-TC VMEM)


def _tile_candidates(dim):
    """Aligned tile sizes dividing `dim`, descending; full extent always included."""
    cands = {dim}
    for t in (1024, 512, 256, 128):
        if dim % t == 0:
            cands.add(t)
    return sorted(cands, reverse=True)


def _k_candidates(f_in):
    """Prefer the full contraction (no K grid axis); fall back to aligned K tiles."""
    cands = [f_in]
    for t in (2048, 1024, 512, 256, 128):
        if t < f_in and f_in % t == 0:
            cands.append(t)
    return cands


def _footprint_bytes(tm, tn, tk, x_item, a_item, k_tiled):
    fp = 2 * tm * tk * x_item        # X tile, double-buffered
    fp += 2 * tm * tn * x_item       # out tile, double-buffered
    fp += 2 * tk * tn * a_item       # A slice, double-buffered
    fp += 2 * 8 * tn * 4             # bias slice (sublane-padded, f32)
    if k_tiled:
        fp += tm * tn * 4            # f32 accumulator scratch
    return fp


def _plan_tiles(N, f_in, f_out, x_item, a_item, budget_bytes):
    """Prefer: large TN (A resident, lane-dense out) > large TM > full-K; K-tile rather
    than collapsing TM/TN when the footprint exceeds the budget."""
    for tn in _tile_candidates(f_out):
        for tm in _tile_candidates(N):
            for tk in _k_candidates(f_in):
                fp = _footprint_bytes(tm, tn, tk, x_item, a_item, tk < f_in)
                if fp <= budget_bytes:
                    return tm, tn, tk
    return (_tile_candidates(N)[-1], _tile_candidates(f_out)[-1],
            _k_candidates(f_in)[-1])


# ---------------------------------------------------------------------------
# Wrapper
# ---------------------------------------------------------------------------
def pointnet_block(x, A, B, cT, *, tm=None, tn=None, tk=None,
                   vmem_limit_bytes=None, allow_xla_fallback=True):
    """x: (batch, N, F_in) or (N, F_in) -> same leading shape with F_out last.
    B may be None (no_B=True)."""
    orig_ndim = x.ndim
    if orig_ndim == 2:
        x = x[None]
    bsz, N, f_in = x.shape
    f_out = A.shape[1]

    # --- Hoisted broadcast term (tiny): bias[b] = mean_N(X[b]) @ B + cT ---------------
    # Must see the FULL N axis, so it lives in the wrapper, not the N-tiled kernel.
    if B is not None:
        xmean = jnp.mean(x.astype(jnp.float32), axis=1)                  # (bsz, F_in)
        bias = xmean @ B.astype(jnp.float32) + cT.astype(jnp.float32)    # (bsz, F_out)
    else:
        bias = jnp.broadcast_to(cT.astype(jnp.float32), (bsz, f_out))
    bias = bias.reshape(bsz, 1, f_out)

    # --- Lane-sparse / tiny shapes: XLA is near-roofline, kernel overhead dominates ----
    if allow_xla_fallback and (f_out < 128 or f_in < 128 or N < 8):
        out = (jnp.einsum("bnf,fo->bno", x.astype(jnp.float32),
                          A.astype(jnp.float32)) + bias).astype(x.dtype)
        return out if orig_ndim == 3 else out[0]

    # --- Enforce matching operand dtypes (true bf16 path when x is bf16) ---------------
    A = A.astype(x.dtype)
    x_item = jnp.dtype(x.dtype).itemsize
    a_item = jnp.dtype(A.dtype).itemsize

    # --- Generation-aware tile / VMEM planning -----------------------------------------
    capacity = _vmem_capacity_bytes()
    budget = int(0.7 * capacity)
    p_tm, p_tn, p_tk = _plan_tiles(N, f_in, f_out, x_item, a_item, budget)
    TM = tm if tm is not None else p_tm
    TN = tn if tn is not None else p_tn
    TK = tk if tk is not None else p_tk
    assert N % TM == 0 and f_out % TN == 0 and f_in % TK == 0, \
        "tile sizes must divide N / F_out / F_in"

    k_tiled = TK < f_in
    footprint = _footprint_bytes(TM, TN, TK, x_item, a_item, k_tiled)
    if vmem_limit_bytes is None:
        vmem_limit_bytes = min(int(0.9 * capacity),
                               max(32 << 20, int(1.25 * footprint) + (2 << 20)))
        # Never clamp below the real double-buffered need.
        vmem_limit_bytes = max(vmem_limit_bytes, footprint + (1 << 20))
    vmem_limit_bytes = int(vmem_limit_bytes)

    # --- Grid: (batch, f_out-tile, N-tile[, f_in-tile]); N innermost so A / bias block
    #     indices are constant over the inner loop (DMA skipped when unchanged). --------
    if not k_tiled:
        grid = (bsz, f_out // TN, N // TM)
        in_specs = [
            pl.BlockSpec((None, TM, f_in), lambda b, j, i: (b, i, 0)),   # X (streams)
            pl.BlockSpec((f_in, TN), lambda b, j, i: (0, j)),            # A (resident per j)
            pl.BlockSpec((None, 1, TN), lambda b, j, i: (b, 0, j)),      # bias
        ]
        out_specs = pl.BlockSpec((None, TM, TN), lambda b, j, i: (b, i, j))
        scratch_shapes = []
        kernel = _pointnet_kernel
        semantics = ("parallel", "parallel", "parallel")
    else:
        grid = (bsz, f_out // TN, N // TM, f_in // TK)
        in_specs = [
            pl.BlockSpec((None, TM, TK), lambda b, j, i, k: (b, i, k)),
            pl.BlockSpec((TK, TN), lambda b, j, i, k: (k, j)),
            pl.BlockSpec((None, 1, TN), lambda b, j, i, k: (b, 0, j)),
        ]
        out_specs = pl.BlockSpec((None, TM, TN), lambda b, j, i, k: (b, i, j))
        scratch_shapes = [pltpu.VMEM((TM, TN), jnp.float32)]
        kernel = _pointnet_kernel_ktiled
        semantics = ("parallel", "parallel", "parallel", "arbitrary")

    out = pl.pallas_call(
        kernel,
        out_shape=jax.ShapeDtypeStruct((bsz, N, f_out), x.dtype),
        grid_spec=pltpu.PrefetchScalarGridSpec(
            num_scalar_prefetch=0,
            grid=grid,
            in_specs=in_specs,
            out_specs=out_specs,
            scratch_shapes=scratch_shapes,
        ),
        compiler_params=pltpu.CompilerParams(
            dimension_semantics=semantics,
            vmem_limit_bytes=vmem_limit_bytes,
        ),
    )(x, A, bias)
    return out if orig_ndim == 3 else out[0]


# ---------------------------------------------------------------------------
# Parameter init (mirrors PointNetBlock.reset_parameters) and pure-JAX reference
# ---------------------------------------------------------------------------
def init_params(key, input_feat_dim, output_feat_dim, dtype=jnp.float32):
    """kaiming_uniform_(a=sqrt(5)) on a 2D (in, out) weight == U(-1/sqrt(fan_in), ...),
    where PyTorch's fan_in for a 2D tensor is its second dim (output_feat_dim)."""
    kA, kB, kC = jax.random.split(key, 3)
    bound_w = 1.0 / jnp.sqrt(output_feat_dim)
    A = jax.random.uniform(kA, (input_feat_dim, output_feat_dim), dtype,
                           minval=-bound_w, maxval=bound_w)
    B = jax.random.uniform(kB, (input_feat_dim, output_feat_dim), dtype,
                           minval=-bound_w, maxval=bound_w)
    bound_c = 1.0 / jnp.sqrt(output_feat_dim)
    cT = jax.random.uniform(kC, (1, output_feat_dim), dtype,
                            minval=-bound_c, maxval=bound_c)
    return A, B, cT


def pointnet_block_ref(x, A, B, cT):
    xa = jnp.einsum("bnf,fo->bno", x, A)
    if B is not None:
        xmean = jnp.mean(x, axis=1, keepdims=True)              # (batch, 1, F_in)
        xa = xa + jnp.einsum("bnf,fo->bno", xmean, B)            # (batch, 1, F_out) bcast
    return xa + cT[None]


# ---------------------------------------------------------------------------
if __name__ == "__main__":
    key = jax.random.PRNGKey(0)
    k1, k2, k3, k4, k5, k6 = jax.random.split(key, 6)

    # 1) Tiny, module-consistent shapes -> lane-sparse, dispatched to XLA fallback.
    batch, N, f_in, f_out = 2, 16, 8, 32
    x = jax.random.normal(k1, (batch, N, f_in), dtype=jnp.float32)
    A, B, cT = init_params(k2, f_in, f_out)
    out = jax.block_until_ready(pointnet_block(x, A, B, cT))
    ref = pointnet_block_ref(x, A, B, cT)
    assert out.shape == (batch, N, f_out)
    assert jnp.allclose(out, ref, atol=1e-5, rtol=1e-5)

    # 2) Pallas path: 128-aligned lane-dense tiles, A fully resident (TN == f_out).
    batch, N, f_in, f_out = 2, 256, 128, 128
    x = jax.random.normal(k3, (batch, N, f_in), dtype=jnp.float32)
    A, B, cT = init_params(k4, f_in, f_out)
    out = jax.block_until_ready(pointnet_block(x, A, B, cT))
    ref = pointnet_block_ref(x, A, B, cT)
    assert out.shape == (batch, N, f_out)
    assert jnp.allclose(out, ref, atol=1e-4, rtol=1e-4)

    # 2b) no_B path (B is None) through the same Pallas kernel.
    out_nb = jax.block_until_ready(pointnet_block(x, A, None, cT))
    ref_nb = pointnet_block_ref(x, A, None, cT)
    assert jnp.allclose(out_nb, ref_nb, atol=1e-4, rtol=1e-4)

    # 3) Forced K-tiled accumulator path (f_in split across an "arbitrary" grid axis).
    batch, N, f_in, f_out = 2, 256, 256, 128
    x = jax.random.normal(k5, (batch, N, f_in), dtype=jnp.float32)
    A, B, cT = init_params(k6, f_in, f_out)
    out = jax.block_until_ready(pointnet_block(x, A, B, cT, tk=128))
    ref = pointnet_block_ref(x, A, B, cT)
    assert jnp.allclose(out, ref, atol=1e-4, rtol=1e-4)

    # 4) True bf16 path: A cast to match x in the wrapper, f32 accumulation in-kernel.
    out_bf = jax.block_until_ready(pointnet_block(x.astype(jnp.bfloat16), A, B, cT))
    assert out_bf.dtype == jnp.bfloat16
    assert jnp.allclose(out_bf.astype(jnp.float32), ref, atol=7.5e-2, rtol=7.5e-2)

    print("KERNEL_OK")
</pallas_src>

<mosaic_0001>
module attributes {stable_mosaic.version = 11 : i64} {
  func.func @_pointnet_kernel(%arg0: i32, %arg1: i32, %arg2: i32, %arg3: memref<1x256x128xf32, #tpu.memory_space<vmem>>, %arg4: memref<128x128xf32, #tpu.memory_space<vmem>>, %arg5: memref<1x1x128xf32, #tpu.memory_space<vmem>>, %arg6: memref<1x256x128xf32, #tpu.memory_space<vmem>>) attributes {dimension_semantics = [#tpu.dimension_semantics<parallel>, #tpu.dimension_semantics<parallel>, #tpu.dimension_semantics<parallel>], iteration_bounds = array<i64: 2, 1, 1>, scalar_prefetch = 0 : i64, scratch_operands = 0 : i64, tpu.core_type = #tpu.core_type<tc>, window_params = [{transform_indices = @transform_0, window_bounds = array<i64: 1, 256, 128>}, {transform_indices = @transform_1, window_bounds = array<i64: 128, 128>}, {transform_indices = @transform_2, window_bounds = array<i64: 1, 1, 128>}, {transform_indices = @transform_3, window_bounds = array<i64: 1, 256, 128>}]} {
    %c0 = arith.constant 0 : index
    %c0_0 = arith.constant 0 : index
    %c0_1 = arith.constant 0 : index
    %0 = vector.load %arg3[%c0, %c0_0, %c0_1] : memref<1x256x128xf32, #tpu.memory_space<vmem>>, vector<1x256x128xf32>
    %1 = vector.shape_cast %0 : vector<1x256x128xf32> to vector<256x128xf32>
    %c0_2 = arith.constant 0 : index
    %c0_3 = arith.constant 0 : index
    %2 = vector.load %arg4[%c0_2, %c0_3] : memref<128x128xf32, #tpu.memory_space<vmem>>, vector<128x128xf32>
    %cst = arith.constant dense<0.000000e+00> : vector<256x128xf32>
    %3 = tpu.matmul %1, %2, %cst {dimension_numbers = #tpu.dot_dimension_numbers<[1], [0], [0], [1], [0, 0, 1, 1], [], []>} : vector<256x128xf32>, vector<128x128xf32>, vector<256x128xf32> -> vector<256x128xf32>
    %c0_4 = arith.constant 0 : index
    %c0_5 = arith.constant 0 : index
    %c0_6 = arith.constant 0 : index
    %4 = vector.load %arg5[%c0_4, %c0_5, %c0_6] : memref<1x1x128xf32, #tpu.memory_space<vmem>>, vector<1x1x128xf32>
    %5 = vector.shape_cast %4 : vector<1x1x128xf32> to vector<1x128xf32>
    %6 = vector.broadcast %5 : vector<1x128xf32> to vector<256x128xf32>
    %7 = arith.addf %3, %6 : vector<256x128xf32>
    %c0_7 = arith.constant 0 : index
    %c0_8 = arith.constant 0 : index
    %c0_9 = arith.constant 0 : index
    %8 = vector.load %arg6[%c0_7, %c0_8, %c0_9] : memref<1x256x128xf32, #tpu.memory_space<vmem>>, vector<1x256x128xf32>
    %9 = vector.shape_cast %8 : vector<1x256x128xf32> to vector<256x128xf32>
    %10 = vector.shape_cast %7 : vector<256x128xf32> to vector<1x256x128xf32>
    tpu.vector_store %arg6[%c0_7, %c0_8, %c0_9], %10 {strides = array<i32>} : memref<1x256x128xf32, #tpu.memory_space<vmem>>, vector<1x256x128xf32>,
    return
  }
  func.func @transform_0(%arg0: i32, %arg1: i32, %arg2: i32) -> (i32, i32, i32) {
    %c0_i32 = arith.constant 0 : i32
    %c0_i32_0 = arith.constant 0 : i32
    return %arg0, %arg2, %c0_i32 : i32, i32, i32
  }
  func.func @transform_1(%arg0: i32, %arg1: i32, %arg2: i32) -> (i32, i32) {
    %c0_i32 = arith.constant 0 : i32
    %c0_i32_0 = arith.constant 0 : i32
    return %c0_i32, %arg1 : i32, i32
  }
  func.func @transform_2(%arg0: i32, %arg1: i32, %arg2: i32) -> (i32, i32, i32) {
    %c0_i32 = arith.constant 0 : i32
    %c0_i32_0 = arith.constant 0 : i32
    return %arg0, %c0_i32, %arg1 : i32, i32, i32
  }
  func.func @transform_3(%arg0: i32, %arg1: i32, %arg2: i32) -> (i32, i32, i32) {
    %c0_i32 = arith.constant 0 : i32
    return %arg0, %arg2, %arg1 : i32, i32, i32
  }
}

</mosaic_0001>

<bundles_post_ra>
// kernel: tpu_custom_call.1
= control target key start
LH: loop header
LB: loop body
LE: loop exit
PB: predicated region body
PF: predicated region fallthrough
CT: control target
= control target key end

     0   :  { %8 = vsyncpa [#allocation3], 0  ;;  %s1262_s0 = inlined_call_operand.hbm [shape: f32[2,256,128], index: 0, kind: input, shape index: {}]   ;;  %s1263_s1 = inlined_call_operand.hbm [shape: f32[128,128], index: 1, kind: input, shape index: {}]   ;;  %s1264_s2 = inlined_call_operand.hbm [shape: f32[2,1,128], index: 2, kind: input, shape index: {}]   ;;  %s1265_s3 = inlined_call_operand.hbm [shape: f32[2,256,128], index: 3, kind: output, shape index: {}]  }
   0x1   :  { %10 = vsyncpa [#allocation3 + $0x1], 0 }
   0x2   :  { %11 = vsyncpa [#allocation6], 0 }
   0x3   :  { %12 = vsyncpa [#allocation4], 0 }
   0x4   :  { %14 = vsyncpa [#allocation4 + $0x1], 0  ;;  %s972_s12 = smov 0   ;;  %s974_s13 = smov 0  }
   0x5   :  { %s976_s14 = smov 0   ;;  %s978_s15 = smov 0  }
   0x6   :  { %s980_s16 = smov 0   ;;  %s982_s17 = smov 0  }
   0x7 LB: > { %s39_s18 = sadd.s32 1, %s941_s16  ;;  %s48_s19 = sadd.s32 1, %s933_s14  ;;  %s945_s17 = sphi %s982_s17, %s20_s17   ;;  %s941_s16 = sphi %s980_s16, %s1276_s16   ;;  %s937_s15 = sphi %s978_s15, %s1275_s15   ;;  %s933_s14 = sphi %s976_s14, %s1274_s14   ;;  %s929_s13 = sphi %s974_s13, %s1273_s13   ;;  %s925_s12 = sphi %s972_s12, %s1272_s12  }
   0x8   : > { %p41_p0 = scmp.ge.s32.totalorder %s39_s18, 2  ;;  %p55_p1 = scmp.ne.s32.totalorder %s933_s14, %s929_s13 }
   0x9   : > { %p56_p2 = scmp.eq.s32.totalorder %s945_s17, 0  ;;  %p619_p4 = scmp.ge.s32.totalorder %s945_s17, 2 }
   0xa   : > { %s1278_s18 = smov (%p41_p0, %s39_s18), 0  ;;  %p708_p6 = scmp.lt.s32.totalorder %s945_s17, 2 }
   0xb   : > { %p1012_p3 = por %p56_p2, %p55_p1  ;;  %s43_s21 = ssub.s32 %s941_s16, %s1278_s18 }
   0xc   : > { %p46_p5 = scmp.eq.s32.totalorder %s43_s21, 0  ;;  %s185_s22 = sand.u32 1, %s945_s17  }
   0xd   : > { %s187_s23 = sand.u32 1, %s933_s14   ;;  %s632_s26 = sshll.u32 %s941_s16, 8 }
   0xe   : > { %s1023_s24 = scalar_select %p46_p5, %s933_s14, %s48_s19  }
   0xf   : > { %s620_s25 = sshll.u32 %s187_s23, 8  ;;  %s196_s29 = scalar_lea.hbm %s1262_s0, %s632_s26 }
  0x10   : > { %s189_s30 = scalar_lea.vmem [#allocation2], %s620_s25  ;;  %s197_s5 = sshll.u32 %s196_s29, 4  ;;  %s198_s5 = int_to_ptr.hbm [resolvable:$true] %s197_s5 }
  0x11   : > { %s199_s4 = sshll.u32 %s189_s30, 4  ;;  %p1033_p7 = pnand %p708_p6, %p1012_p3  ;;  %s200_s4 = int_to_ptr.vmem [resolvable:$true] %s199_s4 }
  0x12   : > { %s1037_s7 = scalar_lea.sflag [#allocation3], %s185_s22  ;;  %s947_s8 = smov 128  }
  0x13   : > { %s948_s9 = smov 8   ;;  %s1046_s10 = sadd.s32 4294967295, %s945_s17  }
  0x14   : > { %699 = dma.hbm_to_vmem [thread:$0]  (!%p1033_p7), %s198_s5, 4096, %s200_s4, %s1037_s7, %s947_s8, %s947_s8, %s948_s9  }
  0x15   : > { %s616_s11 = sadd.s32 4294967294, %s945_s17   ;;  %p61_p8 = scmp.ne.s32.totalorder %s929_s13, %s925_s12 }
  0x16   : > { %p62_p9 = scmp.eq.s32.totalorder %s1046_s10, 0  ;;  %p143_p10 = scmp.eq.s32.totalorder %s1046_s10, 1 }
  0x17   : > { %p149_p11 = scmp.eq.s32.totalorder %s616_s11, 1  ;;  %p617_p12 = scmp.ge.s32.totalorder %s945_s17, 1 }
  0x18   : > { %p1056_p13 = por %p62_p9, %p61_p8  ;;  %p1063_p0 = por %p143_p10, %p55_p1 }
  0x19   : > { %p1067_p2 = por %p149_p11, %p61_p8  ;;  %p156_p3 = scmp.lt.s32.totalorder %s945_s17, 3 }
  0x1a   : > { %s169_s26 = sshll.u32 %s1263_s1, 4  ;;  %s949_s28 = smov [#allocation5]   ;;  %s170_s26 = int_to_ptr.hbm [resolvable:$true] %s169_s26 }
  0x1b   : > { %p1075_p5 = pnand %p617_p12, %p156_p3  ;;  %s171_s29 = sshll.u32 %s949_s28, 4  ;;  %s172_s29 = int_to_ptr.vmem [resolvable:$true] %s171_s29 }
  0x1c   : > { %s216_s5 = scalar_lea.hbm %s1264_s2, %s941_s16  ;;  %s212_s22 = scalar_lea.vmem [#allocation7], %s187_s23 }
  0x1d   : > { %p692_p1 = pneg %p1075_p5  ;;  %s218_s11 = sshll.u32 %s216_s5, 4  ;;  %s219_s11 = int_to_ptr.hbm [resolvable:$true] %s218_s11 }
  0x1e   : > { %s220_s25 = sshll.u32 %s212_s22, 4  ;;  %229 = sbr.rel (%p1075_p5) target bundleno = 269 (0x10d), region = 32  ;;  %s221_s25 = int_to_ptr.vmem [resolvable:$true] %s220_s25 }
  0x1f   : > { %p693_p6 = pnand %p692_p1, %p62_p9  ;;  %s231_s28 = sand.u32 (!%p1075_p5), 1, %s1046_s10  }
  0x20   : > { %702 = dma.hbm_to_vmem [thread:$0]  (!%p1033_p7), %s219_s11, 16, %s221_s25, %s1037_s7  }
  0x21   : > { %695 = dma.hbm_to_vmem [thread:$0]  (!%p693_p6), %s170_s26, 2048, %s172_s29, [#allocation6], %s947_s8, %s947_s8, %s948_s9  }
  0x22   : > { %s1099_s30 = sand.u32 (!%p1075_p5), 1, %s929_s13   ;;  %s232_s4 = scalar_lea.sflag (!%p1075_p5), [#allocation3], %s231_s28 }
  0x23   : > { %s624_s23 = sshll.u32 %s1099_s30, 8 }
  0x24   : > { %s1104_s5 = scalar_lea.vmem [#allocation2], %s624_s23 }
  0x25   : > { %908 = dma.done.wait (%p1056_p13), %s232_s4, 4096  }
  0x26   : > { %910 = vsyncadd (%p1056_p13), %s232_s4, 4294963200 }
  0x27   : > { %912 = dma.done.wait (%p62_p9), [#allocation6], 2048  }
  0x28   : > { %914 = vsyncadd (%p62_p9), [#allocation6], 4294965248  ;;  %s249_s6 = scalar_lea.vmem [#allocation7], %s1099_s30 }
  0x29   : > { %916 = dma.done.wait (%p1056_p13), %s232_s4, 16  }
  0x2a   : > { %918 = vsyncadd (%p1056_p13), %s232_s4, 4294967280  ;;  %v326_v0 = vld [vmem:[#allocation5 + $0x78] sm:$0xff]  ;;  %v325_v1 = vld [vmem:[#allocation5 + $0x70] sm:$0xff]  ;;  %s1159_s7 = scalar_lea.vmem [#allocation8], %s624_s23  ;;  %s633_s8 = sshll.u32 %s937_s15, 8 }
  0x2b   : > { %635 = vmatpush.msra.mxu2 %v326_v0  ;;  %636 = vmatpush.msra.mxu3 %v326_v0  ;;  %v324_v2 = vld [vmem:[#allocation5 + $0x68] sm:$0xff]  ;;  %v323_v3 = vld [vmem:[#allocation5 + $0x60] sm:$0xff]  ;;  %v322_v4 = vld [vmem:[#allocation5 + $0x58] sm:$0xff]  ;;  %s491_s19 = scalar_lea.hbm %s1265_s3, %s633_s8  ;;  %s492_s15 = sshll.u32 %s1159_s7, 4  ;;  %s493_s15 = int_to_ptr.vmem [resolvable:$true] %s492_s15 }
  0x2c   : > { %331 = vmatpush.msra.mxu0 %v326_v0  ;;  %634 = vmatpush.msra.mxu1 %v326_v0  ;;  %v321_v5 = vld [vmem:[#allocation5 + $0x50] sm:$0xff]  ;;  %v320_v6 = vld [vmem:[#allocation5 + $0x48] sm:$0xff]  ;;  %v319_v7 = vld [vmem:[#allocation5 + $0x40] sm:$0xff]  ;;  %s494_s26 = sshll.u32 %s491_s19, 4  ;;  %s477_s27 = scalar_lea.sflag [#allocation4], %s1099_s30  ;;  %s495_s26 = int_to_ptr.hbm [resolvable:$true] %s494_s26 }
  0x2d   : > { %638 = vmatpush.msra.mxu2 %v325_v1  ;;  %639 = vmatpush.msra.mxu3 %v325_v1  ;;  %v318_v8 = vld [vmem:[#allocation5 + $0x38] sm:$0xff]  ;;  %v317_v9 = vld [vmem:[#allocation5 + $0x30] sm:$0xff]  ;;  %v316_v10 = vld [vmem:[#allocation5 + $0x28] sm:$0xff]  ;;  %s869_s29 = sshra.s32 %s495_s26, 4  ;;  %s875_s28 = scalar_lea.hbm %s1265_s3, 512  ;;  %s870_s29 = int_to_ptr.hbm [resolvable:$true] %s869_s29 }
  0x2e   : > { %332 = vmatpush.msra.mxu0 %v325_v1  ;;  %637 = vmatpush.msra.mxu1 %v325_v1  ;;  %v315_v11 = vld [vmem:[#allocation5 + $0x20] sm:$0xff]  ;;  %v314_v12 = vld [vmem:[#allocation5 + $0x18] sm:$0xff]  ;;  %v313_v13 = vld [vmem:[#allocation5 + $0x10] sm:$0xff]  ;;  %s871_s11 = scalar_lea.hbm %s870_s29, 256  ;;  %p876_p10 = scmp.lt.s32.totalorder %s870_s29, %s1265_s3 }
  0x2f   : > { %641 = vmatpush.msra.mxu2 %v324_v2  ;;  %642 = vmatpush.msra.mxu3 %v324_v2  ;;  %v312_v14 = vld [vmem:[#allocation5 + $0x8] sm:$0xff]  ;;  %v311_v15 = vld [vmem:[#allocation5] sm:$0xff]  ;;  %v297_v24 = vld [vmem:[%s1104_s5 + $0x90] sm:$0xff]  ;;  %p872_p7 = scmp.ne.s32.totalorder %s870_s29, %s871_s11  ;;  %p877_p11 = scmp.lt.s32.totalorder %s875_s28, %s871_s11 }
  0x30   : > { %333 = vmatpush.msra.mxu0 %v324_v2  ;;  %640 = vmatpush.msra.mxu1 %v324_v2  ;;  %v295_v16 = vld [vmem:[%s1104_s5 + $0x80] sm:$0xff]  ;;  %v296_v20 = vld [vmem:[%s1104_s5 + $0x88] sm:$0xff]  ;;  %v305_v25 = vld [vmem:[%s1104_s5 + $0xd0] sm:$0xff] }
  0x31   : > { %644 = vmatpush.msra.mxu2 %v323_v3  ;;  %645 = vmatpush.msra.mxu3 %v323_v3  ;;  %v303_v17 = vld [vmem:[%s1104_s5 + $0xc0] sm:$0xff]  ;;  %v304_v21 = vld [vmem:[%s1104_s5 + $0xc8] sm:$0xff]  ;;  %v281_v26 = vld [vmem:[%s1104_s5 + $0x10] sm:$0xff]  ;;  %p873_p8 = pnand %p872_p7, %p1063_p0  ;;  %p878_p12 = por %p877_p11, %p876_p10 }
  0x32   : > { %334 = vmatpush.msra.mxu0 %v323_v3  ;;  %643 = vmatpush.msra.mxu1 %v323_v3  ;;  %v279_v18 = vld [vmem:[%s1104_s5] sm:$0xff]  ;;  %v280_v22 = vld [vmem:[%s1104_s5 + $0x8] sm:$0xff]  ;;  %v289_v27 = vld [vmem:[%s1104_s5 + $0x50] sm:$0xff] }
  0x33   : > { %647 = vmatpush.msra.mxu2 %v322_v4  ;;  %648 = vmatpush.msra.mxu3 %v322_v4  ;;  %v287_v19 = vld [vmem:[%s1104_s5 + $0x40] sm:$0xff]  ;;  %v288_v23 = vld [vmem:[%s1104_s5 + $0x48] sm:$0xff]  ;;  %v298_v28 = vld [vmem:[%s1104_s5 + $0x98] sm:$0xff]  ;;  %p874_p9 = pneg %p873_p8 }
  0x34   : > { %335 = vmatpush.msra.mxu0 %v322_v4  ;;  %646 = vmatpush.msra.mxu1 %v322_v4  ;;  %v306_v29 = vld [vmem:[%s1104_s5 + $0xd8] sm:$0xff]  ;;  %v299_v32 = vld [vmem:[%s1104_s5 + $0xa0] sm:$0xff]  ;;  %v300_v36 = vld [vmem:[%s1104_s5 + $0xa8] sm:$0xff] }
  0x35   : > { %650 = vmatpush.msra.mxu2 %v321_v5  ;;  %651 = vmatpush.msra.mxu3 %v321_v5  ;;  %v282_v30 = vld [vmem:[%s1104_s5 + $0x18] sm:$0xff]  ;;  %v307_v33 = vld [vmem:[%s1104_s5 + $0xe0] sm:$0xff]  ;;  %v308_v37 = vld [vmem:[%s1104_s5 + $0xe8] sm:$0xff]  ;;  %p879_p13 = pnand %p878_p12, %p874_p9 }
  0x36   : > { %336 = vmatpush.msra.mxu0 %v321_v5  ;;  %649 = vmatpush.msra.mxu1 %v321_v5  ;;  %v290_v31 = vld [vmem:[%s1104_s5 + $0x58] sm:$0xff]  ;;  %v283_v34 = vld [vmem:[%s1104_s5 + $0x20] sm:$0xff]  ;;  %v284_v38 = vld [vmem:[%s1104_s5 + $0x28] sm:$0xff] }
  0x37   : > { %653 = vmatpush.msra.mxu2 %v320_v6  ;;  %654 = vmatpush.msra.mxu3 %v320_v6  ;;  %v291_v35 = vld [vmem:[%s1104_s5 + $0x60] sm:$0xff]  ;;  %v292_v39 = vld [vmem:[%s1104_s5 + $0x68] sm:$0xff]  ;;  %v301_v40 = vld [vmem:[%s1104_s5 + $0xb0] sm:$0xff] }
  0x38   : > { %337 = vmatpush.msra.mxu0 %v320_v6  ;;  %652 = vmatpush.msra.mxu1 %v320_v6  ;;  %v309_v41 = vld [vmem:[%s1104_s5 + $0xf0] sm:$0xff]  ;;  %v302_v44 = vld [vmem:[%s1104_s5 + $0xb8] sm:$0xff]  ;;  %v1153_v48 = vld [vmem:[%s249_s6] ss:$0 sm:$0xff] }
  0x39   : > { %656 = vmatpush.msra.mxu2 %v319_v7  ;;  %657 = vmatpush.msra.mxu3 %v319_v7  ;;  %v285_v42 = vld [vmem:[%s1104_s5 + $0x30] sm:$0xff]  ;;  %v310_v45 = vld [vmem:[%s1104_s5 + $0xf8] sm:$0xff] }
  0x3a   : > { %338 = vmatpush.msra.mxu0 %v319_v7  ;;  %655 = vmatpush.msra.mxu1 %v319_v7  ;;  %v293_v43 = vld [vmem:[%s1104_s5 + $0x70] sm:$0xff]  ;;  %v286_v46 = vld [vmem:[%s1104_s5 + $0x38] sm:$0xff] }
  0x3b   : > { %659 = vmatpush.msra.mxu2 %v318_v8  ;;  %660 = vmatpush.msra.mxu3 %v318_v8  ;;  %v294_v47 = vld [vmem:[%s1104_s5 + $0x78] sm:$0xff] }
  0x3c   : > { %339 = vmatpush.msra.mxu0 %v318_v8  ;;  %658 = vmatpush.msra.mxu1 %v318_v8 }
  0x3d   : > { %662 = vmatpush.msra.mxu2 %v317_v9  ;;  %663 = vmatpush.msra.mxu3 %v317_v9 }
  0x3e   : > { %340 = vmatpush.msra.mxu0 %v317_v9  ;;  %661 = vmatpush.msra.mxu1 %v317_v9 }
  0x3f   : > { %665 = vmatpush.msra.mxu2 %v316_v10  ;;  %666 = vmatpush.msra.mxu3 %v316_v10 }
  0x40   : > { %341 = vmatpush.msra.mxu0 %v316_v10  ;;  %664 = vmatpush.msra.mxu1 %v316_v10 }
  0x41   : > { %668 = vmatpush.msra.mxu2 %v315_v11  ;;  %669 = vmatpush.msra.mxu3 %v315_v11 }
  0x42   : > { %342 = vmatpush.msra.mxu0 %v315_v11  ;;  %667 = vmatpush.msra.mxu1 %v315_v11 }
  0x43   : > { %671 = vmatpush.msra.mxu2 %v314_v12  ;;  %672 = vmatpush.msra.mxu3 %v314_v12 }
  0x44   : > { %343 = vmatpush.msra.mxu0 %v314_v12  ;;  %670 = vmatpush.msra.mxu1 %v314_v12 }
  0x45   : > { %674 = vmatpush.msra.mxu2 %v313_v13  ;;  %675 = vmatpush.msra.mxu3 %v313_v13 }
  0x46   : > { %344 = vmatpush.msra.mxu0 %v313_v13  ;;  %673 = vmatpush.msra.mxu1 %v313_v13 }
  0x47   : > { %677 = vmatpush.msra.mxu2 %v312_v14  ;;  %678 = vmatpush.msra.mxu3 %v312_v14 }
  0x48   : > { %345 = vmatpush.msra.mxu0 %v312_v14  ;;  %676 = vmatpush.msra.mxu1 %v312_v14 }
  0x49   : > { %680 = vmatpush.msra.mxu2 %v311_v15  ;;  %681 = vmatpush.msra.mxu3 %v311_v15 }
  0x4a   : > { %395 = vmatmul.f32.vlgmr.msra.gmra.mxu2 %v295_v16  ;;  %419 = vmatmul.f32.vlgmr.msra.gmra.mxu3 %v303_v17 }
  0x4b   : > { %346 = vmatpush.msra.mxu0 %v311_v15  ;;  %679 = vmatpush.msra.mxu1 %v311_v15 }
  0x4c   : > { %347 = vmatmul.f32.vlgmr.msra.gmra.mxu0 %v279_v18  ;;  %371 = vmatmul.f32.vlgmr.msra.gmra.mxu1 %v287_v19 }
  0x52   : > { %398 = vmatmul.f32.gmra.mxu2 %v296_v20  ;;  %422 = vmatmul.f32.gmra.mxu3 %v304_v21 }
  0x54   : > { %350 = vmatmul.f32.gmra.mxu0 %v280_v22  ;;  %374 = vmatmul.f32.gmra.mxu1 %v288_v23 }
  0x5a   : > { %401 = vmatmul.f32.gmra.mxu2 %v297_v24  ;;  %425 = vmatmul.f32.gmra.mxu3 %v305_v25 }
  0x5c   : > { %353 = vmatmul.f32.gmra.mxu0 %v281_v26  ;;  %377 = vmatmul.f32.gmra.mxu1 %v289_v27 }
  0x62   : > { %404 = vmatmul.f32.gmra.mxu2 %v298_v28  ;;  %428 = vmatmul.f32.gmra.mxu3 %v306_v29 }
  0x64   : > { %356 = vmatmul.f32.gmra.mxu0 %v282_v30  ;;  %380 = vmatmul.f32.gmra.mxu1 %v290_v31 }
  0x6a   : > { %407 = vmatmul.f32.gmra.mxu2 %v299_v32  ;;  %431 = vmatmul.f32.gmra.mxu3 %v307_v33 }
  0x6c   : > { %359 = vmatmul.f32.gmra.mxu0 %v283_v34  ;;  %383 = vmatmul.f32.gmra.mxu1 %v291_v35 }
  0x72   : > { %410 = vmatmul.f32.gmra.mxu2 %v300_v36  ;;  %434 = vmatmul.f32.gmra.mxu3 %v308_v37 }
  0x74   : > { %362 = vmatmul.f32.gmra.mxu0 %v284_v38  ;;  %386 = vmatmul.f32.gmra.mxu1 %v292_v39 }
  0x7a   : > { %413 = vmatmul.f32.gmra.mxu2 %v301_v40  ;;  %437 = vmatmul.f32.gmra.mxu3 %v309_v41 }
  0x7c   : > { %365 = vmatmul.f32.gmra.mxu0 %v285_v42  ;;  %389 = vmatmul.f32.gmra.mxu1 %v293_v43 }
  0x82   : > { %416 = vmatmul.f32.gmra.mxu2 %v302_v44  ;;  %440 = vmatmul.f32.gmra.mxu3 %v310_v45 }
  0x84   : > { %368 = vmatmul.f32.gmra.mxu0 %v286_v46  ;;  %392 = vmatmul.f32.gmra.mxu1 %v294_v47 }
  0xc9   : > { %v348_v49 = vpop.f32.mrf.mxu0  ;;  %v372_v50 = vpop.f32.mrf.mxu1 }
  0xca   : > { %v349_v51 = vadd.f32 %v1153_v48, %v348_v49  ;;  %v373_v52 = vadd.f32 %v1153_v48, %v372_v50 }
  0xcc   : > { %444 = vst [vmem:[%s1159_s7] sm:$0xff] %v349_v51 }
  0xcd   : > { %452 = vst [vmem:[%s1159_s7 + $0x40] sm:$0xff] %v373_v52  ;;  %v396_v53 = vpop.f32.mrf.mxu2  ;;  %v420_v54 = vpop.f32.mrf.mxu3 }
  0xce   : > { %v397_v55 = vadd.f32 %v1153_v48, %v396_v53  ;;  %v421_v56 = vadd.f32 %v1153_v48, %v420_v54 }
  0xd0   : > { %460 = vst [vmem:[%s1159_s7 + $0x80] sm:$0xff] %v397_v55 }
  0xd1   : > { %468 = vst [vmem:[%s1159_s7 + $0xc0] sm:$0xff] %v421_v56  ;;  %v351_v57 = vpop.f32.mrf.mxu0  ;;  %v375_v58 = vpop.f32.mrf.mxu1 }
  0xd2   : > { %v352_v59 = vadd.f32 %v1153_v48, %v351_v57  ;;  %v376_v60 = vadd.f32 %v1153_v48, %v375_v58 }
  0xd4   : > { %445 = vst [vmem:[%s1159_s7 + $0x8] sm:$0xff] %v352_v59 }
  0xd5   : > { %453 = vst [vmem:[%s1159_s7 + $0x48] sm:$0xff] %v376_v60  ;;  %v399_v61 = vpop.f32.mrf.mxu2  ;;  %v423_v62 = vpop.f32.mrf.mxu3 }
  0xd6   : > { %v400_v63 = vadd.f32 %v1153_v48, %v399_v61  ;;  %v424_v0 = vadd.f32 %v1153_v48, %v423_v62 }
  0xd8   : > { %461 = vst [vmem:[%s1159_s7 + $0x88] sm:$0xff] %v400_v63 }
  0xd9   : > { %469 = vst [vmem:[%s1159_s7 + $0xc8] sm:$0xff] %v424_v0  ;;  %v354_v1 = vpop.f32.mrf.mxu0  ;;  %v378_v2 = vpop.f32.mrf.mxu1 }
  0xda   : > { %v355_v3 = vadd.f32 %v1153_v48, %v354_v1  ;;  %v379_v4 = vadd.f32 %v1153_v48, %v378_v2 }
  0xdc   : > { %446 = vst [vmem:[%s1159_s7 + $0x10] sm:$0xff] %v355_v3 }
  0xdd   : > { %454 = vst [vmem:[%s1159_s7 + $0x50] sm:$0xff] %v379_v4  ;;  %v402_v5 = vpop.f32.mrf.mxu2  ;;  %v426_v6 = vpop.f32.mrf.mxu3 }
  0xde   : > { %v403_v7 = vadd.f32 %v1153_v48, %v402_v5  ;;  %v427_v8 = vadd.f32 %v1153_v48, %v426_v6 }
  0xe0   : > { %462 = vst [vmem:[%s1159_s7 + $0x90] sm:$0xff] %v403_v7 }
  0xe1   : > { %470 = vst [vmem:[%s1159_s7 + $0xd0] sm:$0xff] %v427_v8  ;;  %v357_v9 = vpop.f32.mrf.mxu0  ;;  %v381_v10 = vpop.f32.mrf.mxu1 }
  0xe2   : > { %v358_v11 = vadd.f32 %v1153_v48, %v357_v9  ;;  %v382_v12 = vadd.f32 %v1153_v48, %v381_v10 }
  0xe4   : > { %447 = vst [vmem:[%s1159_s7 + $0x18] sm:$0xff] %v358_v11 }
  0xe5   : > { %455 = vst [vmem:[%s1159_s7 + $0x58] sm:$0xff] %v382_v12  ;;  %v405_v13 = vpop.f32.mrf.mxu2  ;;  %v429_v14 = vpop.f32.mrf.mxu3 }
  0xe6   : > { %v406_v15 = vadd.f32 %v1153_v48, %v405_v13  ;;  %v430_v16 = vadd.f32 %v1153_v48, %v429_v14 }
  0xe8   : > { %463 = vst [vmem:[%s1159_s7 + $0x98] sm:$0xff] %v406_v15 }
  0xe9   : > { %471 = vst [vmem:[%s1159_s7 + $0xd8] sm:$0xff] %v430_v16  ;;  %v360_v17 = vpop.f32.mrf.mxu0  ;;  %v384_v18 = vpop.f32.mrf.mxu1 }
  0xea   : > { %v361_v19 = vadd.f32 %v1153_v48, %v360_v17  ;;  %v385_v20 = vadd.f32 %v1153_v48, %v384_v18 }
  0xec   : > { %448 = vst [vmem:[%s1159_s7 + $0x20] sm:$0xff] %v361_v19 }
  0xed   : > { %456 = vst [vmem:[%s1159_s7 + $0x60] sm:$0xff] %v385_v20  ;;  %v408_v21 = vpop.f32.mrf.mxu2  ;;  %v432_v22 = vpop.f32.mrf.mxu3 }
  0xee   : > { %v409_v23 = vadd.f32 %v1153_v48, %v408_v21  ;;  %v433_v24 = vadd.f32 %v1153_v48, %v432_v22 }
  0xf0   : > { %464 = vst [vmem:[%s1159_s7 + $0xa0] sm:$0xff] %v409_v23 }
  0xf1   : > { %472 = vst [vmem:[%s1159_s7 + $0xe0] sm:$0xff] %v433_v24  ;;  %v363_v25 = vpop.f32.mrf.mxu0  ;;  %v387_v26 = vpop.f32.mrf.mxu1 }
  0xf2   : > { %v364_v27 = vadd.f32 %v1153_v48, %v363_v25  ;;  %v388_v28 = vadd.f32 %v1153_v48, %v387_v26 }
  0xf4   : > { %449 = vst [vmem:[%s1159_s7 + $0x28] sm:$0xff] %v364_v27 }
  0xf5   : > { %457 = vst [vmem:[%s1159_s7 + $0x68] sm:$0xff] %v388_v28  ;;  %v411_v29 = vpop.f32.mrf.mxu2  ;;  %v435_v30 = vpop.f32.mrf.mxu3 }
  0xf6   : > { %v412_v31 = vadd.f32 %v1153_v48, %v411_v29  ;;  %v436_v32 = vadd.f32 %v1153_v48, %v435_v30 }
  0xf8   : > { %465 = vst [vmem:[%s1159_s7 + $0xa8] sm:$0xff] %v412_v31 }
  0xf9   : > { %473 = vst [vmem:[%s1159_s7 + $0xe8] sm:$0xff] %v436_v32  ;;  %v366_v33 = vpop.f32.mrf.mxu0  ;;  %v390_v34 = vpop.f32.mrf.mxu1 }
  0xfa   : > { %v367_v35 = vadd.f32 %v1153_v48, %v366_v33  ;;  %v391_v36 = vadd.f32 %v1153_v48, %v390_v34 }
  0xfc   : > { %450 = vst [vmem:[%s1159_s7 + $0x30] sm:$0xff] %v367_v35 }
  0xfd   : > { %458 = vst [vmem:[%s1159_s7 + $0x70] sm:$0xff] %v391_v36  ;;  %v414_v37 = vpop.f32.mrf.mxu2  ;;  %v438_v38 = vpop.f32.mrf.mxu3 }
  0xfe   : > { %v415_v39 = vadd.f32 %v1153_v48, %v414_v37  ;;  %v439_v40 = vadd.f32 %v1153_v48, %v438_v38 }
 0x100   : > { %466 = vst [vmem:[%s1159_s7 + $0xb0] sm:$0xff] %v415_v39 }
 0x101   : > { %474 = vst [vmem:[%s1159_s7 + $0xf0] sm:$0xff] %v439_v40  ;;  %v369_v41 = vpop.f32.mrf.mxu0  ;;  %v393_v42 = vpop.f32.mrf.mxu1 }
 0x102   : > { %v370_v43 = vadd.f32 %v1153_v48, %v369_v41  ;;  %v394_v44 = vadd.f32 %v1153_v48, %v393_v42 }
 0x104   : > { %451 = vst [vmem:[%s1159_s7 + $0x38] sm:$0xff] %v370_v43 }
 0x105   : > { %459 = vst [vmem:[%s1159_s7 + $0x78] sm:$0xff] %v394_v44  ;;  %v417_v45 = vpop.f32.mrf.mxu2  ;;  %v441_v46 = vpop.f32.mrf.mxu3 }
 0x106   : > { %v418_v47 = vadd.f32 %v1153_v48, %v417_v45  ;;  %v442_v49 = vadd.f32 %v1153_v48, %v441_v46 }
 0x108   : > { %467 = vst [vmem:[%s1159_s7 + $0xb8] sm:$0xff] %v418_v47 }
 0x109   : > { %475 = vst [vmem:[%s1159_s7 + $0xf8] sm:$0xff] %v442_v49 }
 0x10a   : > { %882 = shalt.err (!%p879_p13)
}
 0x10b   : > { %s950_s30 = smov 128   ;;  %s951_s5 = smov 8  }
 0x10c   : > { %690 = dma.vmem_to_hbm [thread:$0]  (%p1063_p0), %s493_s15, 4096, %s495_s26, %s477_s27, %s950_s30, %s950_s30, %s951_s5  }
 0x10d PF: > { %s509_s6 = sand.u32 1, %s925_s12   ;;  %p704_p3 = pnand %p619_p4, %p1067_p2 }
 0x10e   : > { %s510_s7 = scalar_lea.sflag [#allocation4], %s509_s6 }
 0x10f   : > { %p705_p5 = pneg %p704_p3 }
 0x111   : > { %920 = dma.done.wait (%p705_p5), %s510_s7, 4096  }
 0x112   : > { %922 = vsyncadd (%p705_p5), %s510_s7, 4294963200  ;;  %s20_s17 = sadd.s32 1, %s945_s17   ;;  %s1272_s12 = smov %s929_s13 }
 0x113   : > { %p17_p1 = scmp.ge.s32.totalorder %s20_s17, 4   ;;  %s1273_s13 = smov %s933_s14 }
 0x114   : > { %s1274_s14 = smov %s1023_s24  ;;  %s1275_s15 = smov %s941_s16 }
 0x115   : > { %s1276_s16 = smov %s1278_s18  ;;  %19 = sbr.rel (!%p17_p1) target bundleno = 7 (0x7), region = 93 }
 0x11a   :  { %516 = vsyncpa [#allocation3], 1 }
 0x11b   :  { %518 = vsyncpa [#allocation3 + $0x1], 1 }
 0x11c   :  { %519 = vsyncpa [#allocation6], 1 }
 0x11d   :  { %520 = vsyncpa [#allocation4], 1 }
 0x11e   :  { %522 = vsyncpa [#allocation4 + $0x1], 1 }

</bundles_post_ra>
